<compile_context>
chip_gen: v7x
topology: tpu7x:2x2x1
jax: 0.10.0
libtpu: 0.0.40
codegen_flags: <defaults>
</compile_context>

<pallas_src>
import math

import jax
import jax.numpy as jnp
from jax.experimental import pallas as pl
from jax.experimental.pallas import tpu as pltpu

LANE = 128            # lane width / MXU-friendly feature padding
SUBLANE_F32 = 8       # f32 sublane granularity
MAX_BATCH_TILE = 4096  # hard cap on the batch tile


def _cdiv(a, b):
    return -(-a // b)


def _round_up(n, m):
    return _cdiv(n, m) * m


def _pad2(a, rows, cols):
    r, c = a.shape
    if r == rows and c == cols:
        return a
    return jnp.pad(a, ((0, rows - r), (0, cols - c)))


def mlp_kernel(x_ref, w1_ref, b1_ref, w2_ref, b2_ref, w3_ref, b3_ref, o_ref):
    """Fused 3-layer MLP on one (TB, D_pad) batch tile.

    Matmul inputs are bf16 (MXU fast path), accumulation + bias/ReLU in f32
    (VPU; v5e has no bf16 VALU). Dropout is identity in eval mode.
    """
    x = x_ref[...]                                                     # (TB, D_pad) bf16

    # fc1 + ReLU
    h = jnp.dot(x, w1_ref[...], preferred_element_type=jnp.float32)    # f32 acc
    h = jnp.maximum(h + b1_ref[...], 0.0)                               # f32 epilogue
    h = h.astype(jnp.bfloat16)

    # fc2 + ReLU
    h = jnp.dot(h, w2_ref[...], preferred_element_type=jnp.float32)
    h = jnp.maximum(h + b2_ref[...], 0.0)
    h = h.astype(jnp.bfloat16)

    # fc3 — lane-dense (TB, C_pad) output, unmasked bf16 store
    out = jnp.dot(h, w3_ref[...], preferred_element_type=jnp.float32)
    o_ref[...] = (out + b3_ref[...]).astype(o_ref.dtype)


def init_linear_params(key, in_features, out_features):
    """nn.Linear default init U(-1/sqrt(fan_in), +1/sqrt(fan_in)).

    Weight stored as (in_features, out_features) — transposed vs. PyTorch —
    so the kernel computes x @ W directly.
    """
    k_w, k_b = jax.random.split(key)
    bound = 1.0 / math.sqrt(in_features)
    w = jax.random.uniform(k_w, (in_features, out_features), jnp.float32, -bound, bound)
    b = jax.random.uniform(k_b, (1, out_features), jnp.float32, -bound, bound)
    return w, b


def make_mlp_params(key, input_size, num_classes, hidden=32):
    k1, k2, k3 = jax.random.split(key, 3)
    w1, b1 = init_linear_params(k1, input_size, hidden)
    w2, b2 = init_linear_params(k2, hidden, hidden)
    w3, b3 = init_linear_params(k3, hidden, num_classes)
    return dict(w1=w1, b1=b1, w2=w2, b2=b2, w3=w3, b3=b3)


def _physical_vmem_bytes():
    """Per-generation physical VMEM; conservative fallback = v7x (64 MiB)."""
    try:
        return int(pltpu.get_tpu_info().vmem_capacity_bytes)
    except Exception:
        return 64 * 1024 * 1024


def _choose_batch_tile(batch, d_pad, c_pad, weight_vmem_bytes, phys_vmem):
    """Byte-budget-derived, padding-balanced batch tile.

    Returns (tb, b_pad, vmem_footprint_bytes)."""
    # Streamed bytes per batch row: bf16 x in + bf16 out.
    row_bytes = d_pad * 2 + c_pad * 2
    budget = 3 << 20  # ~3 MiB streamed per grid step
    tb = max(SUBLANE_F32, (budget // row_bytes) // SUBLANE_F32 * SUBLANE_F32)
    tb = min(tb, MAX_BATCH_TILE)

    b_min = _round_up(batch, SUBLANE_F32)
    if b_min <= tb:
        # Whole batch fits one tile; split in two when possible so v7x's two
        # TensorCores both get a grid step ("parallel" batch axis).
        if b_min >= 2 * SUBLANE_F32:
            tb = _round_up(_cdiv(b_min, 2), SUBLANE_F32)
        else:
            tb = b_min
    else:
        # Balance the tile across the real batch to minimize padded rows
        # (e.g. batch=513 no longer pads to 1024).
        n = _cdiv(b_min, tb)
        tb = _round_up(_cdiv(b_min, n), SUBLANE_F32)

    def footprint(t):
        return (2 * t * d_pad * 2           # x double buffer (bf16)
                + 2 * t * c_pad * 2         # out double buffer (bf16)
                + weight_vmem_bytes         # resident weights / biases
                + 6 * t * LANE * 4)         # f32 intermediates headroom

    # Shrink the tile if the double-buffered footprint would not fit VMEM
    # (matters for huge d_pad, and for v7x's smaller 64 MiB VMEM).
    while tb > SUBLANE_F32 and footprint(tb) > phys_vmem - (8 << 20):
        tb = max(SUBLANE_F32, _round_up(tb // 2, SUBLANE_F32))

    b_pad = _round_up(b_min, tb)
    return tb, b_pad, footprint(tb)


def mlp_forward(x, params):
    """x: (N, C, H, W) or any (N, ...) tensor — flattened like nn.Flatten()."""
    batch = x.shape[0]
    x2 = x.reshape(batch, -1)                         # nn.Flatten()
    d_in = x2.shape[1]
    hidden = params["w1"].shape[1]
    num_classes = params["w3"].shape[1]

    # --- lane-dense padding of the feature axes (128-lane; zeros are exact) ---
    d_pad = _round_up(d_in, LANE)
    h_pad = _round_up(hidden, LANE)
    c_pad = _round_up(num_classes, LANE)

    # Weights/biases: tiny, padded once, VMEM-resident across the whole grid.
    w1p = _pad2(params["w1"], d_pad, h_pad).astype(jnp.bfloat16)
    w2p = _pad2(params["w2"], h_pad, h_pad).astype(jnp.bfloat16)
    w3p = _pad2(params["w3"], h_pad, c_pad).astype(jnp.bfloat16)
    b1p = _pad2(params["b1"], 1, h_pad)               # biases stay f32 (epilogue)
    b2p = _pad2(params["b2"], 1, h_pad)
    b3p = _pad2(params["b3"], 1, c_pad)

    weight_vmem = (2 * 2 * (w1p.size + w2p.size + w3p.size)     # bf16, double-buffered
                   + 2 * 4 * (b1p.size + b2p.size + b3p.size))  # f32, double-buffered
    phys_vmem = _physical_vmem_bytes()
    tb, b_pad, vmem_fp = _choose_batch_tile(batch, d_pad, c_pad, weight_vmem, phys_vmem)
    n_tiles = b_pad // tb

    # --- x path: single materialization (bf16 first, pad only if needed) ---
    x_bf16 = x2.astype(jnp.bfloat16)
    if batch == b_pad and d_in == d_pad:
        x_p = x_bf16
    else:
        x_p = _pad2(x_bf16, b_pad, d_pad)

    # --- cost hint for XLA's scheduler ---
    flops = 2 * b_pad * (d_pad * h_pad + h_pad * h_pad + h_pad * c_pad)
    bytes_accessed = (x_p.size * 2
                      + (w1p.size + w2p.size + w3p.size) * 2
                      + (b1p.size + b2p.size + b3p.size) * 4
                      + b_pad * c_pad * 2)                     # bf16 writeback
    cost = pl.CostEstimate(flops=flops, transcendentals=0,
                           bytes_accessed=bytes_accessed)

    vmem_limit = int(min(max(vmem_fp * 3 // 2, 32 << 20),
                         max(phys_vmem - (4 << 20), 32 << 20)))

    grid_spec = pltpu.PrefetchScalarGridSpec(
        num_scalar_prefetch=0,
        grid=(n_tiles,),
        in_specs=[
            pl.BlockSpec((tb, d_pad), lambda i: (i, 0)),      # x: tiled over batch
            pl.BlockSpec((d_pad, h_pad), lambda i: (0, 0)),   # weights: resident
            pl.BlockSpec((1, h_pad), lambda i: (0, 0)),
            pl.BlockSpec((h_pad, h_pad), lambda i: (0, 0)),
            pl.BlockSpec((1, h_pad), lambda i: (0, 0)),
            pl.BlockSpec((h_pad, c_pad), lambda i: (0, 0)),
            pl.BlockSpec((1, c_pad), lambda i: (0, 0)),
        ],
        out_specs=pl.BlockSpec((tb, c_pad), lambda i: (i, 0)),
    )

    out_p = pl.pallas_call(
        mlp_kernel,
        out_shape=jax.ShapeDtypeStruct((b_pad, c_pad), jnp.bfloat16),
        grid_spec=grid_spec,
        compiler_params=pltpu.CompilerParams(
            dimension_semantics=("parallel",),
            vmem_limit_bytes=vmem_limit,
            allow_input_fusion=[True, False, False, False, False, False, False],
        ),
        cost_estimate=cost,
    )(x_p, w1p, b1p, w2p, b2p, w3p, b3p)

    out = out_p[:batch, :num_classes].astype(jnp.float32)
    # torch's x.squeeze(-1): removes last dim only if it is size 1.
    if out.shape[-1] == 1:
        out = out.reshape(out.shape[:-1])
    return out


def mlp_reference(x, params, bf16_matmul=True):
    """Pure-JAX reference of the same forward pass (optionally bf16 matmul inputs)."""
    batch = x.shape[0]
    h = x.reshape(batch, -1).astype(jnp.float32)

    def lin(a, w, b):
        if bf16_matmul:
            a = a.astype(jnp.bfloat16)
            w = w.astype(jnp.bfloat16)
        return jnp.dot(a, w, preferred_element_type=jnp.float32) + b

    h = jnp.maximum(lin(h, params["w1"], params["b1"]), 0.0)
    h = jnp.maximum(lin(h, params["w2"], params["b2"]), 0.0)
    out = lin(h, params["w3"], params["b3"])
    if out.shape[-1] == 1:
        out = out.reshape(out.shape[:-1])
    return out


if __name__ == "__main__":
    # Small shapes consistent with the module: NCHW image-like input,
    # input_size = C*H*W = 4*4*4 = 64, regression head (num_classes = 1).
    batch, channels, height, width = 2, 4, 4, 4
    input_size = channels * height * width
    num_classes = 1

    key = jax.random.PRNGKey(0)
    k_x, k_p = jax.random.split(key)
    x = jax.random.normal(k_x, (batch, channels, height, width), jnp.float32)
    params = make_mlp_params(k_p, input_size, num_classes)

    out = mlp_forward(x, params)
    out = jax.block_until_ready(out)

    ref_bf16 = mlp_reference(x, params, bf16_matmul=True)
    ref_bf16 = ref_bf16.astype(jnp.bfloat16).astype(jnp.float32)   # kernel emits bf16
    ref_f32 = mlp_reference(x, params, bf16_matmul=False)
    assert out.shape == ref_f32.shape == (batch,), (out.shape, ref_f32.shape)
    assert jnp.allclose(out, ref_bf16, atol=2e-2, rtol=2e-2), "mismatch vs bf16 reference"
    assert jnp.allclose(out, ref_f32, atol=6e-2, rtol=6e-2), "mismatch vs f32 reference"

    print("KERNEL_OK")
</pallas_src>

<mosaic_0001>
module attributes {stable_mosaic.version = 11 : i64} {
  func.func @mlp_kernel(%arg0: i32, %arg1: memref<8x128xbf16, #tpu.memory_space<vmem>>, %arg2: memref<128x128xbf16, #tpu.memory_space<vmem>>, %arg3: memref<1x128xf32, #tpu.memory_space<vmem>>, %arg4: memref<128x128xbf16, #tpu.memory_space<vmem>>, %arg5: memref<1x128xf32, #tpu.memory_space<vmem>>, %arg6: memref<128x128xbf16, #tpu.memory_space<vmem>>, %arg7: memref<1x128xf32, #tpu.memory_space<vmem>>, %arg8: memref<8x128xbf16, #tpu.memory_space<vmem>>) attributes {dimension_semantics = [#tpu.dimension_semantics<parallel>], iteration_bounds = array<i64: 1>, scalar_prefetch = 0 : i64, scratch_operands = 0 : i64, tpu.core_type = #tpu.core_type<tc>, window_params = [{transform_indices = @transform_0, window_bounds = array<i64: 8, 128>}, {pipeline_mode = #tpu.pipeline_mode<synchronous>, transform_indices = @transform_1, window_bounds = array<i64: 128, 128>}, {pipeline_mode = #tpu.pipeline_mode<synchronous>, transform_indices = @transform_2, window_bounds = array<i64: 1, 128>}, {pipeline_mode = #tpu.pipeline_mode<synchronous>, transform_indices = @transform_3, window_bounds = array<i64: 128, 128>}, {pipeline_mode = #tpu.pipeline_mode<synchronous>, transform_indices = @transform_4, window_bounds = array<i64: 1, 128>}, {pipeline_mode = #tpu.pipeline_mode<synchronous>, transform_indices = @transform_5, window_bounds = array<i64: 128, 128>}, {pipeline_mode = #tpu.pipeline_mode<synchronous>, transform_indices = @transform_6, window_bounds = array<i64: 1, 128>}, {transform_indices = @transform_7, window_bounds = array<i64: 8, 128>}]} {
    %c0 = arith.constant 0 : index
    %c0_0 = arith.constant 0 : index
    %0 = vector.load %arg1[%c0, %c0_0] : memref<8x128xbf16, #tpu.memory_space<vmem>>, vector<8x128xbf16>
    %c0_1 = arith.constant 0 : index
    %c0_2 = arith.constant 0 : index
    %1 = vector.load %arg2[%c0_1, %c0_2] : memref<128x128xbf16, #tpu.memory_space<vmem>>, vector<128x128xbf16>
    %cst = arith.constant dense<0.000000e+00> : vector<8x128xf32>
    %2 = tpu.matmul %0, %1, %cst {dimension_numbers = #tpu.dot_dimension_numbers<[1], [0], [0], [1], [0, 0, 1, 1], [], []>} : vector<8x128xbf16>, vector<128x128xbf16>, vector<8x128xf32> -> vector<8x128xf32>
    %c0_3 = arith.constant 0 : index
    %c0_4 = arith.constant 0 : index
    %3 = vector.load %arg3[%c0_3, %c0_4] : memref<1x128xf32, #tpu.memory_space<vmem>>, vector<1x128xf32>
    %4 = vector.broadcast %3 : vector<1x128xf32> to vector<8x128xf32>
    %5 = arith.addf %2, %4 : vector<8x128xf32>
    %cst_5 = arith.constant 0.000000e+00 : f32
    %6 = vector.broadcast %cst_5 : f32 to vector<8x128xf32>
    %7 = arith.maximumf %5, %6 : vector<8x128xf32>
    %8 = arith.truncf %7 : vector<8x128xf32> to vector<8x128xbf16>
    %c0_6 = arith.constant 0 : index
    %c0_7 = arith.constant 0 : index
    %9 = vector.load %arg4[%c0_6, %c0_7] : memref<128x128xbf16, #tpu.memory_space<vmem>>, vector<128x128xbf16>
    %cst_8 = arith.constant dense<0.000000e+00> : vector<8x128xf32>
    %10 = tpu.matmul %8, %9, %cst_8 {dimension_numbers = #tpu.dot_dimension_numbers<[1], [0], [0], [1], [0, 0, 1, 1], [], []>} : vector<8x128xbf16>, vector<128x128xbf16>, vector<8x128xf32> -> vector<8x128xf32>
    %c0_9 = arith.constant 0 : index
    %c0_10 = arith.constant 0 : index
    %11 = vector.load %arg5[%c0_9, %c0_10] : memref<1x128xf32, #tpu.memory_space<vmem>>, vector<1x128xf32>
    %12 = vector.broadcast %11 : vector<1x128xf32> to vector<8x128xf32>
    %13 = arith.addf %10, %12 : vector<8x128xf32>
    %cst_11 = arith.constant 0.000000e+00 : f32
    %14 = vector.broadcast %cst_11 : f32 to vector<8x128xf32>
    %15 = arith.maximumf %13, %14 : vector<8x128xf32>
    %16 = arith.truncf %15 : vector<8x128xf32> to vector<8x128xbf16>
    %c0_12 = arith.constant 0 : index
    %c0_13 = arith.constant 0 : index
    %17 = vector.load %arg6[%c0_12, %c0_13] : memref<128x128xbf16, #tpu.memory_space<vmem>>, vector<128x128xbf16>
    %cst_14 = arith.constant dense<0.000000e+00> : vector<8x128xf32>
    %18 = tpu.matmul %16, %17, %cst_14 {dimension_numbers = #tpu.dot_dimension_numbers<[1], [0], [0], [1], [0, 0, 1, 1], [], []>} : vector<8x128xbf16>, vector<128x128xbf16>, vector<8x128xf32> -> vector<8x128xf32>
    %c0_15 = arith.constant 0 : index
    %c0_16 = arith.constant 0 : index
    %19 = vector.load %arg7[%c0_15, %c0_16] : memref<1x128xf32, #tpu.memory_space<vmem>>, vector<1x128xf32>
    %20 = vector.broadcast %19 : vector<1x128xf32> to vector<8x128xf32>
    %21 = arith.addf %18, %20 : vector<8x128xf32>
    %22 = arith.truncf %21 : vector<8x128xf32> to vector<8x128xbf16>
    %c0_17 = arith.constant 0 : index
    %c0_18 = arith.constant 0 : index
    %23 = vector.load %arg8[%c0_17, %c0_18] : memref<8x128xbf16, #tpu.memory_space<vmem>>, vector<8x128xbf16>
    tpu.vector_store %arg8[%c0_17, %c0_18], %22 {strides = array<i32>} : memref<8x128xbf16, #tpu.memory_space<vmem>>, vector<8x128xbf16>,
    return
  }
  func.func @transform_0(%arg0: i32) -> (i32, i32) {
    %c0_i32 = arith.constant 0 : i32
    %c0_i32_0 = arith.constant 0 : i32
    return %arg0, %c0_i32 : i32, i32
  }
  func.func @transform_1(%arg0: i32) -> (i32, i32) {
    %c0_i32 = arith.constant 0 : i32
    %c0_i32_0 = arith.constant 0 : i32
    %c0_i32_1 = arith.constant 0 : i32
    return %c0_i32, %c0_i32_0 : i32, i32
  }
  func.func @transform_2(%arg0: i32) -> (i32, i32) {
    %c0_i32 = arith.constant 0 : i32
    %c0_i32_0 = arith.constant 0 : i32
    %c0_i32_1 = arith.constant 0 : i32
    return %c0_i32, %c0_i32_0 : i32, i32
  }
  func.func @transform_3(%arg0: i32) -> (i32, i32) {
    %c0_i32 = arith.constant 0 : i32
    %c0_i32_0 = arith.constant 0 : i32
    %c0_i32_1 = arith.constant 0 : i32
    return %c0_i32, %c0_i32_0 : i32, i32
  }
  func.func @transform_4(%arg0: i32) -> (i32, i32) {
    %c0_i32 = arith.constant 0 : i32
    %c0_i32_0 = arith.constant 0 : i32
    %c0_i32_1 = arith.constant 0 : i32
    return %c0_i32, %c0_i32_0 : i32, i32
  }
  func.func @transform_5(%arg0: i32) -> (i32, i32) {
    %c0_i32 = arith.constant 0 : i32
    %c0_i32_0 = arith.constant 0 : i32
    %c0_i32_1 = arith.constant 0 : i32
    return %c0_i32, %c0_i32_0 : i32, i32
  }
  func.func @transform_6(%arg0: i32) -> (i32, i32) {
    %c0_i32 = arith.constant 0 : i32
    %c0_i32_0 = arith.constant 0 : i32
    %c0_i32_1 = arith.constant 0 : i32
    return %c0_i32, %c0_i32_0 : i32, i32
  }
  func.func @transform_7(%arg0: i32) -> (i32, i32) {
    %c0_i32 = arith.constant 0 : i32
    %c0_i32_0 = arith.constant 0 : i32
    return %arg0, %c0_i32 : i32, i32
  }
}

</mosaic_0001>

<bundles_post_ra>
// kernel: tpu_custom_call.1
= control target key start
LH: loop header
LB: loop body
LE: loop exit
PB: predicated region body
PF: predicated region fallthrough
CT: control target
= control target key end

     0   :  { %12 = vsyncpa [#allocation3], 0  ;;  %s860_s0 = inlined_call_operand.hbm [shape: bf16[8,128], index: 0, kind: input, shape index: {}]   ;;  %s861_s1 = inlined_call_operand.hbm [shape: bf16[128,128], index: 1, kind: input, shape index: {}]   ;;  %s862_s2 = inlined_call_operand.vmem [shape: f32[1,128], index: 2, kind: input, shape index: {}]   ;;  %s863_s3 = inlined_call_operand.hbm [shape: bf16[128,128], index: 3, kind: input, shape index: {}]   ;;  %s864_s4 = inlined_call_operand.vmem [shape: f32[1,128], index: 4, kind: input, shape index: {}]   ;;  %s865_s5 = inlined_call_operand.hbm [shape: bf16[128,128], index: 5, kind: input, shape index: {}]   ;;  %s866_s6 = inlined_call_operand.vmem [shape: f32[1,128], index: 6, kind: input, shape index: {}]   ;;  %s867_s7 = inlined_call_operand.hbm [shape: bf16[8,128], index: 7, kind: output, shape index: {}]  }
   0x1   :  { %13 = vsyncpa [#allocation6], 0 }
   0x2   :  { %14 = vsyncpa [#allocation9], 0 }
   0x3   :  { %15 = vsyncpa [#allocation4], 0  ;;  %s703_s24 = smov [#allocation5]   ;;  %s585_s28 = scalar_lea.hbm %s861_s1, 1024 }
   0x4   :  { %s31_s25 = sshll.u32 %s703_s24, 4  ;;  %p586_p0 = scmp.ne.s32.totalorder %s861_s1, %s585_s28  ;;  %s32_s25 = int_to_ptr.vmem [resolvable:$true] %s31_s25 }
   0x5   :  { %p589_p1 = scmp.lt.u32.totalorder %s585_s28, %s861_s1 }
   0x7   :  { %p591_p2 = pnand %p589_p1, %p586_p0 }
   0x9   :  { %594 = shalt.err (!%p591_p2)
}
   0xa   :  { %s595_s10 = scalar_lea.vmem %s32_s25, 1024  ;;  %p600_p4 = scmp.lt.s32.totalorder %s32_s25, %s32_s25 }
   0xb   :  { %p596_p3 = scmp.ne.s32.totalorder %s32_s25, %s595_s10  ;;  %p601_p5 = scmp.lt.s32.totalorder %s595_s10, %s595_s10 }
   0xd   :  { %p602_p6 = por %p601_p5, %p600_p4 }
   0xf   :  { %p603_p7 = pnand %p602_p6, %p596_p3 }
  0x11   :  { %606 = shalt.err (!%p603_p7)
}
  0x12   :  { %s704_s11 = smov 64   ;;  %s705_s12 = smov 4  }
  0x13   :  { %37 = dma.hbm_to_vmem [thread:$0]  %s861_s1, 1024, %s32_s25, [#allocation6], %s704_s11, %s704_s11, %s705_s12  }
  0x14   :  { %s706_s15 = smov [#allocation2]   ;;  %s707_s17 = smov [#allocation7]  }
  0x15   :  { %s22_s16 = sshll.u32 %s706_s15, 4  ;;  %s45_s18 = sshll.u32 %s707_s17, 4  ;;  %s23_s16 = int_to_ptr.vmem [resolvable:$true] %s22_s16  ;;  %s46_s18 = int_to_ptr.vmem [resolvable:$true] %s45_s18 }
  0x16   :  { %s607_s21 = scalar_lea.hbm %s860_s0, 64 }
  0x17   :  { %p608_p8 = scmp.ne.s32.totalorder %s860_s0, %s607_s21  ;;  %p611_p9 = scmp.lt.u32.totalorder %s607_s21, %s860_s0 }
  0x19   :  { %p613_p10 = pnand %p611_p9, %p608_p8 }
  0x1b   :  { %616 = shalt.err (!%p613_p10)
}
  0x1c   :  { %s617_s1 = scalar_lea.vmem %s23_s16, 64  ;;  %p622_p12 = scmp.lt.s32.totalorder %s23_s16, %s23_s16 }
  0x1d   :  { %p618_p11 = scmp.ne.s32.totalorder %s23_s16, %s617_s1  ;;  %p623_p13 = scmp.lt.s32.totalorder %s617_s1, %s617_s1 }
  0x1f   :  { %p624_p0 = por %p623_p13, %p622_p12 }
  0x21   :  { %p625_p1 = pnand %p624_p0, %p618_p11 }
  0x23   :  { %628 = shalt.err (!%p625_p1)
}
  0x24   :  { %25 = dma.hbm_to_vmem [thread:$0]  %s860_s0, 64, %s23_s16, [#allocation3]  }
  0x25   :  { %s629_s30 = scalar_lea.hbm %s863_s3, 1024 }
  0x26   :  { %p630_p2 = scmp.ne.s32.totalorder %s863_s3, %s629_s30  ;;  %p633_p3 = scmp.lt.u32.totalorder %s629_s30, %s863_s3 }
  0x28   :  { %p635_p4 = pnand %p633_p3, %p630_p2 }
  0x2a   :  { %638 = shalt.err (!%p635_p4)
}
  0x2b   :  { %s639_s14 = scalar_lea.vmem %s46_s18, 1024  ;;  %p644_p6 = scmp.lt.s32.totalorder %s46_s18, %s46_s18 }
  0x2c   :  { %p640_p5 = scmp.ne.s32.totalorder %s46_s18, %s639_s14  ;;  %p645_p7 = scmp.lt.s32.totalorder %s639_s14, %s639_s14 }
  0x2e   :  { %p646_p8 = por %p645_p7, %p644_p6 }
  0x30   :  { %p647_p9 = pnand %p646_p8, %p640_p5 }
  0x32   :  { %650 = shalt.err (!%p647_p9)
}
  0x33   :  { %51 = dma.hbm_to_vmem [thread:$0]  %s863_s3, 1024, %s46_s18, [#allocation6], %s704_s11, %s704_s11, %s705_s12  }
  0x34   :  { %s708_s16 = smov [#allocation8]   ;;  %s651_s21 = scalar_lea.hbm %s865_s5, 1024 }
  0x35   :  { %s59_s17 = sshll.u32 %s708_s16, 4  ;;  %p652_p10 = scmp.ne.s32.totalorder %s865_s5, %s651_s21  ;;  %s60_s17 = int_to_ptr.vmem [resolvable:$true] %s59_s17 }
  0x36   :  { %p655_p11 = scmp.lt.u32.totalorder %s651_s21, %s865_s5 }
  0x38   :  { %p657_p12 = pnand %p655_p11, %p652_p10 }
  0x3a   :  { %660 = shalt.err (!%p657_p12)
}
  0x3b   :  { %s661_s1 = scalar_lea.vmem %s60_s17, 1024  ;;  %p666_p0 = scmp.lt.s32.totalorder %s60_s17, %s60_s17 }
  0x3c   :  { %p662_p13 = scmp.ne.s32.totalorder %s60_s17, %s661_s1  ;;  %p667_p1 = scmp.lt.s32.totalorder %s661_s1, %s661_s1 }
  0x3e   :  { %p668_p2 = por %p667_p1, %p666_p0 }
  0x40   :  { %p669_p3 = pnand %p668_p2, %p662_p13 }
  0x42   :  { %672 = shalt.err (!%p669_p3)
}
  0x43   :  { %65 = dma.hbm_to_vmem [thread:$0]  %s865_s5, 1024, %s60_s17, [#allocation9], %s704_s11, %s704_s11, %s705_s12  }
  0x44   :  { %695 = dma.done.wait [#allocation3], 64  }
  0x45   :  { %696 = vsyncadd [#allocation3], 4294967232 }
  0x46   :  { %697 = dma.done.wait [#allocation6], 2048  }
  0x47   :  { %698 = vsyncadd [#allocation6], 4294965248 }
  0x48   :  { %699 = dma.done.wait [#allocation9], 1024  }
  0x49   :  { %700 = vsyncadd [#allocation9], 4294966272  ;;  %v709_v0 = vmov 0.0   ;;  %vm710_vm0 = vmmov 0   ;;  %v561_v1 = vld [vmem:[#allocation5] sm:$0xff]   ;;  %v562_v2 = vld [vmem:[#allocation5 + $0x8] sm:$0xff]  }
  0x4a   :  { %492 = vmatprep.subr.bf16.mxu0 %v709_v0  ;;  %508 = vmatprep.mubr.msk.bf16.mxu0 %vm710_vm0, %v709_v0  ;;  %v563_v3 = vld [vmem:[#allocation5 + $0x10] sm:$0xff]   ;;  %v569_v4 = vld [vmem:[#allocation7] sm:$0xff]   ;;  %v564_v5 = vld [vmem:[#allocation5 + $0x18] sm:$0xff]   ;;  %s711_s28 = smov [#allocation10]  }
  0x4b   :  { %512 = vmatprep.subr.bf16.mxu1 %v709_v0  ;;  %528 = vmatprep.mubr.msk.bf16.mxu1 %vm710_vm0, %v709_v0  ;;  %v570_v6 = vld [vmem:[#allocation7 + $0x8] sm:$0xff]   ;;  %v565_v7 = vld [vmem:[#allocation5 + $0x20] sm:$0xff]   ;;  %v571_v8 = vld [vmem:[#allocation7 + $0x10] sm:$0xff]   ;;  %s427_s29 = sshll.u32 %s711_s28, 4  ;;  %s428_s29 = int_to_ptr.vmem [resolvable:$true] %s427_s29 }
  0x4c   :  { %493 = vmatpush3.bf16.msra.mxu0 %v561_v1  ;;  %513 = vmatpush3.bf16.msra.mxu1 %v569_v4  ;;  %v566_v9 = vld [vmem:[#allocation5 + $0x28] sm:$0xff]   ;;  %v572_v10 = vld [vmem:[#allocation7 + $0x18] sm:$0xff]   ;;  %v567_v11 = vld [vmem:[#allocation5 + $0x30] sm:$0xff]   ;;  %p678_p5 = scmp.lt.s32.totalorder %s428_s29, %s428_s29 }
  0x4d   :  { %494 = vmatprep.subr.bf16.mxu0 %v709_v0  ;;  %514 = vmatprep.subr.bf16.mxu1 %v709_v0  ;;  %v573_v12 = vld [vmem:[#allocation7 + $0x20] sm:$0xff]   ;;  %v568_v13 = vld [vmem:[#allocation5 + $0x38] sm:$0xff]   ;;  %v574_v14 = vld [vmem:[#allocation7 + $0x28] sm:$0xff]  }
  0x4e   :  { %v81_v15 = vld [vmem:[#allocation2] sm:$0xf]  ;;  %v575_v16 = vld [vmem:[#allocation7 + $0x30] sm:$0xff]   ;;  %v577_v18 = vld [vmem:[#allocation8] sm:$0xff]  }
  0x4f   :  { %v576_v17 = vld [vmem:[#allocation7 + $0x38] sm:$0xff]   ;;  %v578_v19 = vld [vmem:[#allocation8 + $0x8] sm:$0xff]   ;;  %v579_v20 = vld [vmem:[#allocation8 + $0x10] sm:$0xff]  }
  0x50   :  { %495 = vmatpush3.bf16.msra.mxu0 %v562_v2  ;;  %515 = vmatpush3.bf16.msra.mxu1 %v570_v6  ;;  %v580_v21 = vld [vmem:[#allocation8 + $0x18] sm:$0xff]   ;;  %v581_v22 = vld [vmem:[#allocation8 + $0x20] sm:$0xff]   ;;  %v582_v23 = vld [vmem:[#allocation8 + $0x28] sm:$0xff]  }
  0x51   :  { %496 = vmatprep.subr.bf16.mxu0 %v709_v0  ;;  %516 = vmatprep.subr.bf16.mxu1 %v709_v0  ;;  %v438_v24 = vld [vmem:[%s862_s2] ss:$0 sm:$0xff]  ;;  %v583_v32 = vld [vmem:[#allocation8 + $0x30] sm:$0xff]  }
  0x52   :  { %v584_v33 = vld [vmem:[#allocation8 + $0x38] sm:$0xff]  }
  0x53   :  { %v447_v34 = vld [vmem:[%s864_s4] ss:$0 sm:$0xff]  ;;  %s673_s4 = scalar_lea.vmem %s428_s29, 64 }
  0x54   :  { %497 = vmatpush3.bf16.msra.mxu0 %v563_v3  ;;  %517 = vmatpush3.bf16.msra.mxu1 %v571_v8  ;;  %v456_v42 = vld [vmem:[%s866_s6] ss:$0 sm:$0xff]  ;;  %p674_p4 = scmp.ne.s32.totalorder %s428_s29, %s673_s4  ;;  %p679_p6 = scmp.lt.s32.totalorder %s673_s4, %s673_s4 }
  0x55   :  { %498 = vmatprep.subr.bf16.mxu0 %v709_v0  ;;  %518 = vmatprep.subr.bf16.mxu1 %v709_v0 }
  0x56   :  { %p680_p7 = por %p679_p6, %p678_p5 }
  0x58   :  { %499 = vmatpush3.bf16.msra.mxu0 %v564_v5  ;;  %519 = vmatpush3.bf16.msra.mxu1 %v572_v10  ;;  %p681_p8 = pnand %p680_p7, %p674_p4 }
  0x59   :  { %500 = vmatprep.subr.bf16.mxu0 %v709_v0  ;;  %520 = vmatprep.subr.bf16.mxu1 %v709_v0 }
  0x5c   :  { %501 = vmatpush3.bf16.msra.mxu0 %v565_v7  ;;  %521 = vmatpush3.bf16.msra.mxu1 %v573_v12 }
  0x5d   :  { %502 = vmatprep.subr.bf16.mxu0 %v709_v0  ;;  %522 = vmatprep.subr.bf16.mxu1 %v709_v0 }
  0x60   :  { %503 = vmatpush3.bf16.msra.mxu0 %v566_v9  ;;  %523 = vmatpush3.bf16.msra.mxu1 %v574_v14 }
  0x61   :  { %504 = vmatprep.subr.bf16.mxu0 %v709_v0  ;;  %524 = vmatprep.subr.bf16.mxu1 %v709_v0 }
  0x64   :  { %505 = vmatpush3.bf16.msra.mxu0 %v567_v11  ;;  %525 = vmatpush3.bf16.msra.mxu1 %v575_v16 }
  0x65   :  { %506 = vmatprep.subr.bf16.mxu0 %v709_v0  ;;  %526 = vmatprep.subr.bf16.mxu1 %v709_v0 }
  0x68   :  { %507 = vmatpush3.bf16.msra.mxu0 %v568_v13  ;;  %527 = vmatpush3.bf16.msra.mxu1 %v576_v17 }
  0x69   :  { %532 = vmatprep.subr.bf16.mxu0 %v709_v0 }
  0x6b   :  { %509 = vmatmul.mubr.bf16.vlgmr.msra.gmra.mrb[0].mxu0 %v81_v15 }
  0x6c   :  { %548 = vmatprep.mubr.msk.bf16.mxu0 %vm710_vm0, %v709_v0  ;;  %533 = vmatpush3.bf16.msra.mxu0 %v577_v18 }
  0x6d   :  { %534 = vmatprep.subr.bf16.mxu0 %v709_v0 }
  0x70   :  { %535 = vmatpush3.bf16.msra.mxu0 %v578_v19 }
  0x71   :  { %536 = vmatprep.subr.bf16.mxu0 %v709_v0 }
  0x74   :  { %537 = vmatpush3.bf16.msra.mxu0 %v579_v20 }
  0x75   :  { %538 = vmatprep.subr.bf16.mxu0 %v709_v0 }
  0x78   :  { %539 = vmatpush3.bf16.msra.mxu0 %v580_v21 }
  0x79   :  { %540 = vmatprep.subr.bf16.mxu0 %v709_v0 }
  0x7c   :  { %541 = vmatpush3.bf16.msra.mxu0 %v581_v22 }
  0x7d   :  { %542 = vmatprep.subr.bf16.mxu0 %v709_v0 }
  0x80   :  { %543 = vmatpush3.bf16.msra.mxu0 %v582_v23 }
  0x81   :  { %544 = vmatprep.subr.bf16.mxu0 %v709_v0 }
  0x84   :  { %545 = vmatpush3.bf16.msra.mxu0 %v583_v32 }
  0x85   :  { %546 = vmatprep.subr.bf16.mxu0 %v709_v0 }
  0x88   :  { %547 = vmatpush3.bf16.msra.mxu0 %v584_v33 }
 0x13e   :  { %v187_v25 = vpop.f32.mrb[0].mxu0 }
 0x13f   :  { %v188_v26 = vadd.f32 %v438_v24, %v187_v25  ;;  %v510_v27 = vpop.f32.mrb[1].mxu0 }
 0x140   :  { %v190_v28 = vpop.f32.mrb[2].mxu0 }
 0x141   :  { %v193_v29 = vmax.f32 %v188_v26, 0.0  ;;  %v511_v30 = vpop.f32.mrb[3].mxu0 }
 0x143   :  { %v194_v31 = vpack.c.bf16 %v193_v29, %v193_v29 }
 0x145   :  { %529 = vmatmul.mubr.bf16.vlgmr.msra.gmra.mrb[0].mxu1 %v194_v31 }
 0x218   :  { %v300_v35 = vpop.f32.mrb[0].mxu1 }
 0x219   :  { %v301_v36 = vadd.f32 %v447_v34, %v300_v35  ;;  %v530_v37 = vpop.f32.mrb[1].mxu1 }
 0x21a   :  { %v303_v38 = vpop.f32.mrb[2].mxu1 }
 0x21b   :  { %v306_v39 = vmax.f32 %v301_v36, 0.0  ;;  %v531_v40 = vpop.f32.mrb[3].mxu1 }
 0x21d   :  { %v307_v41 = vpack.c.bf16 %v306_v39, %v306_v39 }
 0x21f   :  { %549 = vmatmul.mubr.bf16.vlgmr.msra.gmra.mrb[4].mxu0 %v307_v41 }
 0x2f2   :  { %v413_v43 = vpop.f32.mrb[4].mxu0 }
 0x2f3   :  { %v414_v44 = vadd.f32 %v456_v42, %v413_v43  ;;  %v550_v45 = vpop.f32.mrb[5].mxu0 }
 0x2f4   :  { %v416_v46 = vpop.f32.mrb[6].mxu0 }
 0x2f5   :  { %v419_v47 = vpack.c.bf16 %v414_v44, %v414_v44  ;;  %v551_v48 = vpop.f32.mrb[7].mxu0 }
 0x2f7   :  { %420 = vst [vmem:[#allocation10] sm:$0xf] %v419_v47 }
 0x2f8   :  { %684 = shalt.err (!%p681_p8)
}
 0x2f9   :  { %s685_s6 = scalar_lea.hbm %s867_s7, 64 }
 0x2fa   :  { %p686_p9 = scmp.ne.s32.totalorder %s867_s7, %s685_s6  ;;  %p689_p10 = scmp.lt.u32.totalorder %s685_s6, %s867_s7 }
 0x2fc   :  { %p691_p11 = pnand %p689_p10, %p686_p9 }
 0x2fe   :  { %694 = shalt.err (!%p691_p11)
}
 0x2ff   :  { %430 = dma.vmem_to_hbm [thread:$0]  %s428_s29, 64, %s867_s7, [#allocation4]  }
 0x300   :  { %701 = dma.done.wait [#allocation4], 64  }
 0x301   :  { %702 = vsyncadd [#allocation4], 4294967232 }
 0x302   :  { %434 = vsyncpa [#allocation3], 1 }
 0x303   :  { %435 = vsyncpa [#allocation6], 1 }
 0x304   :  { %436 = vsyncpa [#allocation9], 1 }
 0x305   :  { %437 = vsyncpa [#allocation4], 1 }

</bundles_post_ra>
